<compile_context>
chip_gen: v7x
topology: tpu7x:2x2x1
jax: 0.10.0
libtpu: 0.0.40
codegen_flags: <defaults>
</compile_context>

<pallas_src>
import functools

import jax
import jax.numpy as jnp
from jax.experimental import pallas as pl
from jax.experimental.pallas import tpu as pltpu

NUM_ACT_CANDIDATES = 8
_LANE = 128
_SUBLANE = 8
_FEATURE_PAD = _LANE * _SUBLANE        # pad F to a multiple of 1024
_MAX_ROWS_PER_BLOCK = 512              # 512 rows * 128 lanes = 64K feats / step


# ---------------------------------------------------------------------------
# Activation banks
# ---------------------------------------------------------------------------
def _shared_exp_bank(x):
    """All 8 candidates, sharing one exp(-|x|) where mathematically possible.

    Index -> activation:
      0 relu, 1 sigmoid, 2 tanh, 3 swish, 4 leaky-relu(0.01),
      5 elu, 6 gelu (tanh approx), 7 softplus
    """
    ax = jnp.abs(x)
    e = jnp.exp(-ax)                            # shared transcendental
    inv_1pe = 1.0 / (1.0 + e)
    sigmoid = jnp.where(x >= 0, inv_1pe, e * inv_1pe)
    e2 = e * e                                  # exp(-2|x|)
    t_abs = (1.0 - e2) / (1.0 + e2)             # tanh(|x|)
    tanh = jnp.where(x >= 0, t_abs, -t_abs)
    relu = jnp.maximum(x, 0.0)
    swish = x * sigmoid
    leaky = jnp.where(x > 0, x, 0.01 * x)
    elu = jnp.where(x > 0, x, e - 1.0)          # exp(x) - 1 for x <= 0 (finite)
    softplus = relu + jnp.log(1.0 + e)
    # tanh-approximate GELU (matches jax.nn.gelu(approximate=True))
    c = 0.7978845608028654                      # sqrt(2/pi)
    u = c * (x + 0.044715 * x * x * x)
    eg = jnp.exp(-2.0 * jnp.abs(u))
    tg_abs = (1.0 - eg) / (1.0 + eg)
    gelu = 0.5 * x * (1.0 + jnp.where(u >= 0, tg_abs, -tg_abs))
    return (relu, sigmoid, tanh, swish, leaky, elu, gelu, softplus)


# Stand-alone candidates (used by the uniform-mode kernel and the reference).
_ACT_FNS = (
    lambda x: jnp.maximum(x, 0.0),                            # 0 relu
    jax.nn.sigmoid,                                           # 1 sigmoid
    jnp.tanh,                                                 # 2 tanh
    lambda x: x * jax.nn.sigmoid(x),                          # 3 swish
    lambda x: jnp.where(x > 0, x, 0.01 * x),                  # 4 leaky relu
    lambda x: jnp.where(x > 0, x, jnp.expm1(jnp.minimum(x, 0.0))),  # 5 elu
    functools.partial(jax.nn.gelu, approximate=True),         # 6 gelu
    jax.nn.softplus,                                          # 7 softplus
)


# ---------------------------------------------------------------------------
# Kernels
# ---------------------------------------------------------------------------
def _act_select_kernel(idx_ref, x_ref, o_ref):
    """Per-feature-column activation select (OPTIM_MODE == 0).

    idx_ref: (1, S, 128) int32 activation codes (broadcast over batch)
    x_ref  : (B, S, 128) input tile
    """
    x = x_ref[...].astype(jnp.float32)
    idx = idx_ref[...]
    cands = _shared_exp_bank(x)
    out = cands[0]                                 # code 0 (relu): no compare
    for k in range(1, NUM_ACT_CANDIDATES):
        out = jnp.where(idx == k, cands[k], out)
    o_ref[...] = out.astype(o_ref.dtype)


def _act_uniform_kernel(code_ref, x_ref, o_ref):
    """Single activation applied to the whole tile (OPTIM_MODE != 0).

    code_ref: (1,) int32 in SMEM (scalar prefetch); only the selected branch
    executes at runtime, so exactly one activation is computed.
    """
    x = x_ref[...].astype(jnp.float32)
    code = code_ref[0]
    for k, fn in enumerate(_ACT_FNS):
        @pl.when(code == k)
        def _(fn=fn):
            o_ref[...] = fn(x).astype(o_ref.dtype)


# ---------------------------------------------------------------------------
# Wrapper
# ---------------------------------------------------------------------------
def _pad_features(a2d, pad_value=0):
    """Pad the trailing (feature) axis to a multiple of 1024 (= 8*128)."""
    F = a2d.shape[-1]
    Fp = ((F + _FEATURE_PAD - 1) // _FEATURE_PAD) * _FEATURE_PAD
    if Fp != F:
        pad = [(0, 0)] * (a2d.ndim - 1) + [(0, Fp - F)]
        a2d = jnp.pad(a2d, pad, constant_values=pad_value)
    return a2d, Fp


def _rows_per_block(n_rows):
    """Largest convenient multiple-of-8 row count per grid step."""
    for cand in (_MAX_ROWS_PER_BLOCK, 256, 128, 64, 32, 16, _SUBLANE):
        if n_rows % cand == 0:
            return cand
    return n_rows  # unreachable: n_rows is a multiple of 8 after padding


def conv_layer_activation(x, activations, optim_mode=0):
    """JAX/Pallas equivalent of Conv_Layer_Activation.forward.

    x           : (B, C, H, W) float array
    activations : (F,) int array of activation codes, F = C*H*W
    """
    B = x.shape[0]
    F = 1
    for d in x.shape[1:]:
        F *= d

    x2d = x.reshape(B, F)
    x2d, Fp = _pad_features(x2d, 0)
    R = Fp // _LANE                      # feature rows of 128 lanes (mult of 8)
    S = _rows_per_block(R)               # rows per grid step
    grid = (R // S,)
    x3d = x2d.reshape(B, R, _LANE)

    out_shape = jax.ShapeDtypeStruct((B, R, _LANE), x.dtype)
    compiler_params = pltpu.CompilerParams(
        dimension_semantics=("parallel",),
        vmem_limit_bytes=32 * 1024 * 1024,   # blocks are small; explicit budget
    )

    if optim_mode == 0:
        idx = jnp.asarray(activations, dtype=jnp.int32).reshape(1, F)
        idx, _ = _pad_features(idx, 0)
        idx3d = idx.reshape(1, R, _LANE)
        out3d = pl.pallas_call(
            _act_select_kernel,
            out_shape=out_shape,
            grid_spec=pltpu.PrefetchScalarGridSpec(
                num_scalar_prefetch=0,
                grid=grid,
                in_specs=[
                    pl.BlockSpec((1, S, _LANE), lambda i: (0, i, 0)),
                    pl.BlockSpec((B, S, _LANE), lambda i: (0, i, 0)),
                ],
                out_specs=pl.BlockSpec((B, S, _LANE), lambda i: (0, i, 0)),
            ),
            compiler_params=compiler_params,
        )(idx3d, x3d)
    else:
        # OPTIM_MODE != 0: one activation (activations[0]) for everything.
        code = jnp.asarray(activations, dtype=jnp.int32).reshape(-1)[:1]
        out3d = pl.pallas_call(
            _act_uniform_kernel,
            out_shape=out_shape,
            grid_spec=pltpu.PrefetchScalarGridSpec(
                num_scalar_prefetch=1,
                grid=grid,
                in_specs=[
                    pl.BlockSpec((B, S, _LANE), lambda i, code_ref: (0, i, 0)),
                ],
                out_specs=pl.BlockSpec((B, S, _LANE),
                                       lambda i, code_ref: (0, i, 0)),
            ),
            compiler_params=compiler_params,
        )(code, x3d)

    out2d = out3d.reshape(B, Fp)[:, :F]
    return out2d.reshape(x.shape)


# ---------------------------------------------------------------------------
# Pure-JAX reference (independent of the kernel math)
# ---------------------------------------------------------------------------
def _reference(x, activations):
    B = x.shape[0]
    F = activations.shape[0]
    x2d = x.reshape(B, F).astype(jnp.float32)
    cands = jnp.stack([fn(x2d) for fn in _ACT_FNS], axis=-1)   # (B, F, K)
    idx = activations.astype(jnp.int32)[None, :, None]         # (1, F, 1)
    out = jnp.take_along_axis(cands, jnp.broadcast_to(idx, (B, F, 1)),
                              axis=-1)[..., 0]
    return out.astype(x.dtype).reshape(x.shape)


if __name__ == "__main__":
    key = jax.random.PRNGKey(0)
    kx, ka = jax.random.split(key)

    B, C, H, W = 2, 4, 16, 16               # F = 1024
    x = jax.random.normal(kx, (B, C, H, W), dtype=jnp.float32)
    activations = jax.random.randint(
        ka, (C * H * W,), 0, NUM_ACT_CANDIDATES, dtype=jnp.int32)

    # OPTIM_MODE == 0: per-feature-column activation codes.
    out = conv_layer_activation(x, activations, optim_mode=0)
    out = jax.block_until_ready(out)
    ref = _reference(x, activations)
    assert out.shape == x.shape and out.dtype == x.dtype
    assert jnp.allclose(out, ref, atol=1e-5, rtol=1e-5)

    # OPTIM_MODE != 0: activations[0] applied uniformly (scalar-prefetch path).
    out_u = conv_layer_activation(x, activations, optim_mode=1)
    out_u = jax.block_until_ready(out_u)
    ref_u = _reference(
        x, jnp.full((C * H * W,), activations[0], dtype=jnp.int32))
    assert jnp.allclose(out_u, ref_u, atol=1e-5, rtol=1e-5)

    print("KERNEL_OK")
</pallas_src>

<mosaic_0001>
module attributes {stable_mosaic.version = 11 : i64} {
  func.func @_act_select_kernel(%arg0: i32, %arg1: memref<1x8x128xi32, #tpu.memory_space<vmem>>, %arg2: memref<2x8x128xf32, #tpu.memory_space<vmem>>, %arg3: memref<2x8x128xf32, #tpu.memory_space<vmem>>) attributes {dimension_semantics = [#tpu.dimension_semantics<parallel>], iteration_bounds = array<i64: 1>, scalar_prefetch = 0 : i64, scratch_operands = 0 : i64, tpu.core_type = #tpu.core_type<tc>, window_params = [{transform_indices = @transform_0, window_bounds = array<i64: 1, 8, 128>}, {transform_indices = @transform_1, window_bounds = array<i64: 2, 8, 128>}, {transform_indices = @transform_2, window_bounds = array<i64: 2, 8, 128>}]} {
    %c0 = arith.constant 0 : index
    %c0_0 = arith.constant 0 : index
    %c0_1 = arith.constant 0 : index
    %0 = vector.load %arg2[%c0, %c0_0, %c0_1] : memref<2x8x128xf32, #tpu.memory_space<vmem>>, vector<2x8x128xf32>
    %c0_2 = arith.constant 0 : index
    %c0_3 = arith.constant 0 : index
    %c0_4 = arith.constant 0 : index
    %1 = vector.load %arg1[%c0_2, %c0_3, %c0_4] : memref<1x8x128xi32, #tpu.memory_space<vmem>>, vector<1x8x128xi32>
    %2 = math.absf %0 : vector<2x8x128xf32>
    %cst = arith.constant 0.000000e+00 : f32
    %3 = vector.broadcast %cst : f32 to vector<2x8x128xf32>
    %4 = arith.subf %3, %2 : vector<2x8x128xf32>
    %5 = math.exp %4 : vector<2x8x128xf32>
    %cst_5 = arith.constant 1.000000e+00 : f32
    %6 = vector.broadcast %cst_5 : f32 to vector<2x8x128xf32>
    %7 = arith.addf %6, %5 : vector<2x8x128xf32>
    %cst_6 = arith.constant 1.000000e+00 : f32
    %8 = vector.broadcast %cst_6 : f32 to vector<2x8x128xf32>
    %9 = arith.divf %8, %7 : vector<2x8x128xf32>
    %cst_7 = arith.constant 0.000000e+00 : f32
    %10 = vector.broadcast %cst_7 : f32 to vector<2x8x128xf32>
    %11 = arith.cmpf oge, %0, %10 : vector<2x8x128xf32>
    %12 = arith.mulf %5, %9 : vector<2x8x128xf32>
    %13 = arith.select %11, %9, %12 : vector<2x8x128xi1>, vector<2x8x128xf32>
    %14 = arith.mulf %5, %5 : vector<2x8x128xf32>
    %cst_8 = arith.constant 1.000000e+00 : f32
    %15 = vector.broadcast %cst_8 : f32 to vector<2x8x128xf32>
    %16 = arith.subf %15, %14 : vector<2x8x128xf32>
    %cst_9 = arith.constant 1.000000e+00 : f32
    %17 = vector.broadcast %cst_9 : f32 to vector<2x8x128xf32>
    %18 = arith.addf %17, %14 : vector<2x8x128xf32>
    %19 = arith.divf %16, %18 : vector<2x8x128xf32>
    %cst_10 = arith.constant 0.000000e+00 : f32
    %20 = vector.broadcast %cst_10 : f32 to vector<2x8x128xf32>
    %21 = arith.cmpf oge, %0, %20 : vector<2x8x128xf32>
    %cst_11 = arith.constant 0.000000e+00 : f32
    %22 = vector.broadcast %cst_11 : f32 to vector<2x8x128xf32>
    %23 = arith.subf %22, %19 : vector<2x8x128xf32>
    %24 = arith.select %21, %19, %23 : vector<2x8x128xi1>, vector<2x8x128xf32>
    %cst_12 = arith.constant 0.000000e+00 : f32
    %25 = vector.broadcast %cst_12 : f32 to vector<2x8x128xf32>
    %26 = arith.maximumf %0, %25 : vector<2x8x128xf32>
    %27 = arith.mulf %0, %13 : vector<2x8x128xf32>
    %cst_13 = arith.constant 0.000000e+00 : f32
    %28 = vector.broadcast %cst_13 : f32 to vector<2x8x128xf32>
    %29 = arith.cmpf ogt, %0, %28 : vector<2x8x128xf32>
    %cst_14 = arith.constant 0.00999999977 : f32
    %30 = vector.broadcast %cst_14 : f32 to vector<2x8x128xf32>
    %31 = arith.mulf %30, %0 : vector<2x8x128xf32>
    %32 = arith.select %29, %0, %31 : vector<2x8x128xi1>, vector<2x8x128xf32>
    %cst_15 = arith.constant 0.000000e+00 : f32
    %33 = vector.broadcast %cst_15 : f32 to vector<2x8x128xf32>
    %34 = arith.cmpf ogt, %0, %33 : vector<2x8x128xf32>
    %cst_16 = arith.constant 1.000000e+00 : f32
    %35 = vector.broadcast %cst_16 : f32 to vector<2x8x128xf32>
    %36 = arith.subf %5, %35 : vector<2x8x128xf32>
    %37 = arith.select %34, %0, %36 : vector<2x8x128xi1>, vector<2x8x128xf32>
    %cst_17 = arith.constant 1.000000e+00 : f32
    %38 = vector.broadcast %cst_17 : f32 to vector<2x8x128xf32>
    %39 = arith.addf %38, %5 : vector<2x8x128xf32>
    %40 = math.log %39 : vector<2x8x128xf32>
    %41 = arith.addf %26, %40 : vector<2x8x128xf32>
    %cst_18 = arith.constant 4.471500e-02 : f32
    %42 = vector.broadcast %cst_18 : f32 to vector<2x8x128xf32>
    %43 = arith.mulf %42, %0 : vector<2x8x128xf32>
    %44 = arith.mulf %43, %0 : vector<2x8x128xf32>
    %45 = arith.mulf %44, %0 : vector<2x8x128xf32>
    %46 = arith.addf %0, %45 : vector<2x8x128xf32>
    %cst_19 = arith.constant 0.797884583 : f32
    %47 = vector.broadcast %cst_19 : f32 to vector<2x8x128xf32>
    %48 = arith.mulf %47, %46 : vector<2x8x128xf32>
    %49 = math.absf %48 : vector<2x8x128xf32>
    %cst_20 = arith.constant -2.000000e+00 : f32
    %50 = vector.broadcast %cst_20 : f32 to vector<2x8x128xf32>
    %51 = arith.mulf %50, %49 : vector<2x8x128xf32>
    %52 = math.exp %51 : vector<2x8x128xf32>
    %cst_21 = arith.constant 1.000000e+00 : f32
    %53 = vector.broadcast %cst_21 : f32 to vector<2x8x128xf32>
    %54 = arith.subf %53, %52 : vector<2x8x128xf32>
    %cst_22 = arith.constant 1.000000e+00 : f32
    %55 = vector.broadcast %cst_22 : f32 to vector<2x8x128xf32>
    %56 = arith.addf %55, %52 : vector<2x8x128xf32>
    %57 = arith.divf %54, %56 : vector<2x8x128xf32>
    %cst_23 = arith.constant 5.000000e-01 : f32
    %58 = vector.broadcast %cst_23 : f32 to vector<2x8x128xf32>
    %59 = arith.mulf %58, %0 : vector<2x8x128xf32>
    %cst_24 = arith.constant 0.000000e+00 : f32
    %60 = vector.broadcast %cst_24 : f32 to vector<2x8x128xf32>
    %61 = arith.cmpf oge, %48, %60 : vector<2x8x128xf32>
    %cst_25 = arith.constant 0.000000e+00 : f32
    %62 = vector.broadcast %cst_25 : f32 to vector<2x8x128xf32>
    %63 = arith.subf %62, %57 : vector<2x8x128xf32>
    %64 = arith.select %61, %57, %63 : vector<2x8x128xi1>, vector<2x8x128xf32>
    %cst_26 = arith.constant 1.000000e+00 : f32
    %65 = vector.broadcast %cst_26 : f32 to vector<2x8x128xf32>
    %66 = arith.addf %65, %64 : vector<2x8x128xf32>
    %67 = arith.mulf %59, %66 : vector<2x8x128xf32>
    %c1_i32 = arith.constant 1 : i32
    %68 = vector.broadcast %c1_i32 : i32 to vector<1x8x128xi32>
    %69 = arith.cmpi eq, %1, %68 : vector<1x8x128xi32>
    %70 = vector.shape_cast %69 : vector<1x8x128xi1> to vector<1x8x128xi1>
    %71 = vector.broadcast %70 : vector<1x8x128xi1> to vector<2x8x128xi1>
    %72 = arith.select %71, %13, %26 : vector<2x8x128xi1>, vector<2x8x128xf32>
    %c2_i32 = arith.constant 2 : i32
    %73 = vector.broadcast %c2_i32 : i32 to vector<1x8x128xi32>
    %74 = arith.cmpi eq, %1, %73 : vector<1x8x128xi32>
    %75 = vector.shape_cast %74 : vector<1x8x128xi1> to vector<1x8x128xi1>
    %76 = vector.broadcast %75 : vector<1x8x128xi1> to vector<2x8x128xi1>
    %77 = arith.select %76, %24, %72 : vector<2x8x128xi1>, vector<2x8x128xf32>
    %c3_i32 = arith.constant 3 : i32
    %78 = vector.broadcast %c3_i32 : i32 to vector<1x8x128xi32>
    %79 = arith.cmpi eq, %1, %78 : vector<1x8x128xi32>
    %80 = vector.shape_cast %79 : vector<1x8x128xi1> to vector<1x8x128xi1>
    %81 = vector.broadcast %80 : vector<1x8x128xi1> to vector<2x8x128xi1>
    %82 = arith.select %81, %27, %77 : vector<2x8x128xi1>, vector<2x8x128xf32>
    %c4_i32 = arith.constant 4 : i32
    %83 = vector.broadcast %c4_i32 : i32 to vector<1x8x128xi32>
    %84 = arith.cmpi eq, %1, %83 : vector<1x8x128xi32>
    %85 = vector.shape_cast %84 : vector<1x8x128xi1> to vector<1x8x128xi1>
    %86 = vector.broadcast %85 : vector<1x8x128xi1> to vector<2x8x128xi1>
    %87 = arith.select %86, %32, %82 : vector<2x8x128xi1>, vector<2x8x128xf32>
    %c5_i32 = arith.constant 5 : i32
    %88 = vector.broadcast %c5_i32 : i32 to vector<1x8x128xi32>
    %89 = arith.cmpi eq, %1, %88 : vector<1x8x128xi32>
    %90 = vector.shape_cast %89 : vector<1x8x128xi1> to vector<1x8x128xi1>
    %91 = vector.broadcast %90 : vector<1x8x128xi1> to vector<2x8x128xi1>
    %92 = arith.select %91, %37, %87 : vector<2x8x128xi1>, vector<2x8x128xf32>
    %c6_i32 = arith.constant 6 : i32
    %93 = vector.broadcast %c6_i32 : i32 to vector<1x8x128xi32>
    %94 = arith.cmpi eq, %1, %93 : vector<1x8x128xi32>
    %95 = vector.shape_cast %94 : vector<1x8x128xi1> to vector<1x8x128xi1>
    %96 = vector.broadcast %95 : vector<1x8x128xi1> to vector<2x8x128xi1>
    %97 = arith.select %96, %67, %92 : vector<2x8x128xi1>, vector<2x8x128xf32>
    %c7_i32 = arith.constant 7 : i32
    %98 = vector.broadcast %c7_i32 : i32 to vector<1x8x128xi32>
    %99 = arith.cmpi eq, %1, %98 : vector<1x8x128xi32>
    %100 = vector.shape_cast %99 : vector<1x8x128xi1> to vector<1x8x128xi1>
    %101 = vector.broadcast %100 : vector<1x8x128xi1> to vector<2x8x128xi1>
    %102 = arith.select %101, %41, %97 : vector<2x8x128xi1>, vector<2x8x128xf32>
    %c0_27 = arith.constant 0 : index
    %c0_28 = arith.constant 0 : index
    %c0_29 = arith.constant 0 : index
    %103 = vector.load %arg3[%c0_27, %c0_28, %c0_29] : memref<2x8x128xf32, #tpu.memory_space<vmem>>, vector<2x8x128xf32>
    tpu.vector_store %arg3[%c0_27, %c0_28, %c0_29], %102 {strides = array<i32>} : memref<2x8x128xf32, #tpu.memory_space<vmem>>, vector<2x8x128xf32>,
    return
  }
  func.func @transform_0(%arg0: i32) -> (i32, i32, i32) {
    %c0_i32 = arith.constant 0 : i32
    %c0_i32_0 = arith.constant 0 : i32
    %c0_i32_1 = arith.constant 0 : i32
    return %c0_i32, %arg0, %c0_i32_0 : i32, i32, i32
  }
  func.func @transform_1(%arg0: i32) -> (i32, i32, i32) {
    %c0_i32 = arith.constant 0 : i32
    %c0_i32_0 = arith.constant 0 : i32
    %c0_i32_1 = arith.constant 0 : i32
    return %c0_i32, %arg0, %c0_i32_0 : i32, i32, i32
  }
  func.func @transform_2(%arg0: i32) -> (i32, i32, i32) {
    %c0_i32 = arith.constant 0 : i32
    %c0_i32_0 = arith.constant 0 : i32
    %c0_i32_1 = arith.constant 0 : i32
    return %c0_i32, %arg0, %c0_i32_0 : i32, i32, i32
  }
}

</mosaic_0001>

<bundles_post_ra>
// kernel: tpu_custom_call.1
= control target key start
LH: loop header
LB: loop body
LE: loop exit
PB: predicated region body
PF: predicated region fallthrough
CT: control target
= control target key end

     0   :  { %7 = vsyncpa [#allocation3], 0  ;;  %s458_s0 = inlined_call_operand.hbm [shape: s32[1,8,128], index: 0, kind: input, shape index: {}]   ;;  %s459_s1 = inlined_call_operand.hbm [shape: f32[2,8,128], index: 1, kind: input, shape index: {}]   ;;  %s460_s2 = inlined_call_operand.hbm [shape: f32[2,8,128], index: 2, kind: output, shape index: {}]  }
   0x1   :  { %8 = vsyncpa [#allocation6], 0 }
   0x2   :  { %9 = vsyncpa [#allocation4], 0  ;;  %s291_s9 = smov [#allocation2]   ;;  %s292_s11 = smov [#allocation5]  }
   0x3   :  { %s16_s10 = sshll.u32 %s291_s9, 4  ;;  %s25_s12 = sshll.u32 %s292_s11, 4  ;;  %s17_s10 = int_to_ptr.vmem [resolvable:$true] %s16_s10  ;;  %s311_s12 = int_to_ptr.vmem [resolvable:$true] %s25_s12 }
   0x4   :  { %s219_s15 = scalar_lea.hbm %s458_s0, 128 }
   0x5   :  { %p220_p0 = scmp.ne.s32.totalorder %s458_s0, %s219_s15  ;;  %p223_p1 = scmp.lt.u32.totalorder %s219_s15, %s458_s0 }
   0x7   :  { %p225_p2 = pnand %p223_p1, %p220_p0 }
   0x9   :  { %228 = shalt.err (!%p225_p2)
}
   0xa   :  { %s229_s20 = scalar_lea.vmem %s17_s10, 128  ;;  %p234_p4 = scmp.lt.s32.totalorder %s17_s10, %s17_s10 }
   0xb   :  { %p230_p3 = scmp.ne.s32.totalorder %s17_s10, %s229_s20  ;;  %p235_p5 = scmp.lt.s32.totalorder %s229_s20, %s229_s20 }
   0xd   :  { %p236_p6 = por %p235_p5, %p234_p4 }
   0xf   :  { %p237_p7 = pnand %p236_p6, %p230_p3 }
  0x11   :  { %240 = shalt.err (!%p237_p7)
}
  0x12   :  { %19 = dma.hbm_to_vmem [thread:$0]  %s458_s0, 128, %s17_s10, [#allocation3]  }
  0x13   :  { %s241_s25 = scalar_lea.hbm %s459_s1, 256 }
  0x14   :  { %p242_p8 = scmp.ne.s32.totalorder %s459_s1, %s241_s25  ;;  %p245_p9 = scmp.lt.u32.totalorder %s241_s25, %s459_s1 }
  0x16   :  { %p247_p10 = pnand %p245_p9, %p242_p8 }
  0x18   :  { %250 = shalt.err (!%p247_p10)
}
  0x19   :  { %s251_s30 = scalar_lea.vmem %s311_s12, 256  ;;  %p256_p12 = scmp.lt.s32.totalorder %s311_s12, %s311_s12 }
  0x1a   :  { %p252_p11 = scmp.ne.s32.totalorder %s311_s12, %s251_s30  ;;  %p257_p13 = scmp.lt.s32.totalorder %s251_s30, %s251_s30 }
  0x1c   :  { %p258_p0 = por %p257_p13, %p256_p12 }
  0x1e   :  { %p259_p1 = pnand %p258_p0, %p252_p11 }
  0x20   :  { %262 = shalt.err (!%p259_p1)
}
  0x21   :  { %s293_s0 = smov 128   ;;  %s294_s3 = smov 8  }
  0x22   :  { %31 = dma.hbm_to_vmem [thread:$0]  %s459_s1, 256, %s311_s12, [#allocation6], %s293_s0, %s293_s0, %s294_s3  }
  0x23   :  { %285 = dma.done.wait [#allocation3], 128  }
  0x24   :  { %286 = vsyncadd [#allocation3], 4294967168 }
  0x25   :  { %287 = dma.done.wait [#allocation6], 256  }
  0x26   :  { %288 = vsyncadd [#allocation6], 4294967040  ;;  %v345_v0 = vld [vmem:[#allocation5] sm:$0xff]  ;;  %v350_v5 = vld [vmem:[#allocation5 + $0x8] sm:$0xff]  ;;  %s295_s1 = smov [#allocation7]  }
  0x27   :  { %v41_v1 = vand.u32 2147483647, %v345_v0  ;;  %v95_v2 = vmul.f32 0.044715, %v345_v0  ;;  %v42_v7 = vand.u32 2147483647, %v350_v5 }
  0x28   :  { %v96_v10 = vmul.f32 0.044715, %v350_v5  ;;  %v370_v36 = vld [vmem:[#allocation2] sm:$0xff]  ;;  %vm55_vm0 = vcmp.ge.f32.partialorder %v345_v0, 0.0  ;;  %v75_v39 = vmax.f32 %v345_v0, 0.0  ;;  %vm56_vm3 = vcmp.ge.f32.partialorder %v350_v5, 0.0 }
  0x29   :  { %v43_v3 = vsub.f32 0.0, %v41_v1  ;;  %v97_v4 = vmul.f32 %v95_v2, %v345_v0  ;;  %v44_v9 = vsub.f32 0.0, %v42_v7  ;;  %vm133_vm1 = vcmp.eq.s32.totalorder %v370_v36, 1  ;;  %s175_s6 = sshll.u32 %s295_s1, 4  ;;  %s176_s6 = int_to_ptr.vmem [resolvable:$true] %s175_s6 }
  0x2a   :  { %v98_v13 = vmul.f32 %v96_v10, %v350_v5  ;;  %vm138_vm2 = vcmp.eq.s32.totalorder %v370_v36, 2  ;;  %v81_v51 = vmul.f32 0.01, %v345_v0  ;;  %vm79_vm4 = vcmp.gt.f32.partialorder %v345_v0, 0.0  ;;  %s263_s7 = scalar_lea.vmem %s176_s6, 256  ;;  %p268_p3 = scmp.lt.s32.totalorder %s176_s6, %s176_s6 }
  0x2b   :  { %v45_v6 = vmul.f32 1.442695, %v43_v3  ;;  %v99_v8 = vmul.f32 %v97_v4, %v345_v0  ;;  %v47_v12 = vmul.f32 1.442695, %v44_v9  ;;  %v76_v55 = vmax.f32 %v350_v5, 0.0  ;;  %p264_p2 = scmp.ne.s32.totalorder %s176_s6, %s263_s7  ;;  %p269_p4 = scmp.lt.s32.totalorder %s263_s7, %s263_s7 }
  0x2c   :  { %v100_v15 = vmul.f32 %v98_v13, %v350_v5  ;;  %vm143_vm5 = vcmp.eq.s32.totalorder %v370_v36, 3  ;;  %v83_v61 = vsel %vm79_vm4, %v345_v0, %v81_v51  ;;  %vm148_vm6 = vcmp.eq.s32.totalorder %v370_v36, 4 }
  0x2d   :  { %195 = vpow2.f32 %v45_v6  ;;  %v101_v11 = vadd.f32 %v99_v8, %v345_v0  ;;  %v121_v4 = vmul.f32 0.5, %v345_v0  ;;  %vm80_vm8 = vcmp.gt.f32.partialorder %v350_v5, 0.0  ;;  %p270_p5 = por %p269_p4, %p268_p3 }
  0x2e   :  { %197 = vpow2.f32 %v47_v12  ;;  %v102_v17 = vadd.f32 %v100_v15, %v350_v5  ;;  %v82_v6 = vmul.f32 0.01, %v350_v5  ;;  %vm153_vm9 = vcmp.eq.s32.totalorder %v370_v36, 5 }
  0x2f   :  { %v357_v14 = vmul.f32 0.7978846, %v101_v11  ;;  %vm158_vm10 = vcmp.eq.s32.totalorder %v370_v36, 6  ;;  %vm163_vm11 = vcmp.eq.s32.totalorder %v370_v36, 7  ;;  %p271_p6 = pnand %p270_p5, %p264_p2 }
  0x30   :  { %v362_v19 = vmul.f32 0.7978846, %v102_v17 }
  0x31   :  { %v105_v16 = vand.u32 2147483647, %v357_v14  ;;  %vm123_vm7 = vcmp.ge.f32.partialorder %v357_v14, 0.0 }
  0x32   :  { %v106_v22 = vand.u32 2147483647, %v362_v19  ;;  %vm124_vm12 = vcmp.ge.f32.partialorder %v362_v19, 0.0 }
  0x33   :  { %v107_v18 = vmul.f32 -2.0, %v105_v16 }
  0x34   :  { %v108_v25 = vmul.f32 -2.0, %v106_v22 }
  0x35   :  { %v109_v20 = vmul.f32 1.442695, %v107_v18  ;;  %v84_v18 = vsel %vm80_vm8, %v350_v5, %v82_v6 }
  0x36   :  { %v111_v28 = vmul.f32 1.442695, %v108_v25 }
  0x37   :  { %v196_v21 = vpop.eup %195  ;;  %199 = vpow2.f32 %v109_v20 }
  0x38   :  { %v49_v23 = vadd.f32 1.0, %v196_v21  ;;  %v61_v24 = vmul.f32 %v196_v21, %v196_v21  ;;  %v365_v27 = vpop.eup %197  ;;  %v188_v62 = vadd.f32 -1.0, %v196_v21 }
  0x39   :  { %v50_v29 = vadd.f32 1.0, %v365_v27  ;;  %v62_v30 = vmul.f32 %v365_v27, %v365_v27 }
  0x3a   :  { %201 = vrcp.f32 %v49_v23  ;;  %v65_v26 = vadd.f32 1.0, %v61_v24  ;;  %v63_v33 = vsub.f32 1.0, %v61_v24  ;;  %v87_v11 = vsel %vm79_vm4, %v345_v0, %v188_v62 }
  0x3b   :  { %v66_v31 = vadd.f32 1.0, %v62_v30  ;;  %v64_v43 = vsub.f32 1.0, %v62_v30 }
  0x3c   :  { %203 = vrcp.f32 %v65_v26 }
  0x3d   :  { %205 = vpow2.f32 %v111_v28 }
  0x3e   :  { %207 = vrcp.f32 %v50_v29 }
  0x3f   :  { %209 = vrcp.f32 %v66_v31 }
  0x40   :  { %211 = vlog2.f32 %v49_v23 }
  0x41   :  { %v200_v32 = vpop.eup %199 }
  0x42   :  { %v115_v34 = vadd.f32 1.0, %v200_v32  ;;  %v113_v54 = vsub.f32 1.0, %v200_v32 }
  0x44   :  { %v202_v35 = vpop.eup %201  ;;  %213 = vrcp.f32 %v115_v34 }
  0x45   :  { %v57_v37 = vmul.f32 %v202_v35, %v196_v21  ;;  %215 = vlog2.f32 %v50_v29  ;;  %v122_v29 = vmul.f32 0.5, %v350_v5 }
  0x46   :  { %v204_v38 = vpop.eup %203 }
  0x47   :  { %v206_v40 = vpop.eup %205  ;;  %v59_v41 = vsel %vm55_vm0, %v202_v35, %v57_v37  ;;  %v68_v42 = vmul.f32 %v204_v38, %v63_v33 }
  0x48   :  { %v208_v44 = vpop.eup %207  ;;  %v116_v47 = vadd.f32 1.0, %v206_v40  ;;  %v136_v49 = vsel %vm133_vm1, %v59_v41, %v75_v39  ;;  %v77_v53 = vmul.f32 %v59_v41, %v345_v0  ;;  %v114_v10 = vsub.f32 1.0, %v206_v40 }
  0x49   :  { %v71_v45 = vsub.f32 0.0, %v68_v42  ;;  %v58_v46 = vmul.f32 %v208_v44, %v365_v27  ;;  %v210_v48 = vpop.eup %209  ;;  %v189_v0 = vadd.f32 -1.0, %v365_v27 }
  0x4a   :  { %v70_v52 = vmul.f32 %v210_v48, %v64_v43  ;;  %217 = vrcp.f32 %v116_v47  ;;  %v212_v59 = vpop.eup %211 }
  0x4b   :  { %v73_v50 = vsel %vm55_vm0, %v68_v42, %v71_v45  ;;  %v60_v57 = vsel %vm56_vm3, %v208_v44, %v58_v46  ;;  %v90_v7 = vmul.f32 0.6931472, %v212_v59  ;;  %v88_v27 = vsel %vm80_vm8, %v350_v5, %v189_v0 }
  0x4c   :  { %v141_v56 = vsel %vm138_vm2, %v73_v50, %v136_v49  ;;  %v72_v58 = vsub.f32 0.0, %v70_v52  ;;  %v137_v3 = vsel %vm133_vm1, %v60_v57, %v76_v55  ;;  %v78_v9 = vmul.f32 %v60_v57, %v350_v5 }
  0x4d   :  { %v146_v1 = vsel %vm143_vm5, %v77_v53, %v141_v56  ;;  %v93_v20 = vadd.f32 %v90_v7, %v75_v39 }
  0x4e   :  { %v214_v60 = vpop.eup %213  ;;  %v74_v2 = vsel %vm56_vm3, %v70_v52, %v72_v58  ;;  %v151_v12 = vsel %vm148_vm6, %v83_v61, %v146_v1 }
  0x4f   :  { %v118_v63 = vmul.f32 %v214_v60, %v113_v54  ;;  %v142_v13 = vsel %vm138_vm2, %v74_v2, %v137_v3  ;;  %v216_v14 = vpop.eup %215  ;;  %v156_v21 = vsel %vm153_vm9, %v87_v11, %v151_v12 }
  0x50   :  { %v147_v23 = vsel %vm143_vm5, %v78_v9, %v142_v13  ;;  %v92_v25 = vmul.f32 0.6931472, %v216_v14 }
  0x51   :  { %v125_v8 = vsub.f32 0.0, %v118_v63  ;;  %v152_v30 = vsel %vm148_vm6, %v84_v18, %v147_v23 }
  0x52   :  { %v94_v33 = vadd.f32 %v92_v25, %v76_v55  ;;  %v157_v34 = vsel %vm153_vm9, %v88_v27, %v152_v30 }
  0x53   :  { %v127_v15 = vsel %vm123_vm7, %v118_v63, %v125_v8 }
  0x54   :  { %v218_v16 = vpop.eup %217  ;;  %v129_v17 = vadd.f32 1.0, %v127_v15 }
  0x55   :  { %v120_v22 = vmul.f32 %v218_v16, %v114_v10 }
  0x56   :  { %v131_v24 = vmul.f32 %v129_v17, %v121_v4 }
  0x57   :  { %v126_v26 = vsub.f32 0.0, %v120_v22 }
  0x58   :  { %v161_v28 = vsel %vm158_vm10, %v131_v24, %v156_v21 }
  0x59   :  { %v166_v31 = vsel %vm163_vm11, %v93_v20, %v161_v28  ;;  %v128_v32 = vsel %vm124_vm12, %v120_v22, %v126_v26 }
  0x5a   :  { %168 = vst [vmem:[#allocation7] sm:$0xff] %v166_v31  ;;  %v130_v19 = vadd.f32 1.0, %v128_v32 }
  0x5c   :  { %v132_v35 = vmul.f32 %v130_v19, %v122_v29 }
  0x5e   :  { %v162_v37 = vsel %vm158_vm10, %v132_v35, %v157_v34 }
  0x5f   :  { %v167_v5 = vsel %vm163_vm11, %v94_v33, %v162_v37 }
  0x60   :  { %169 = vst [vmem:[#allocation7 + $0x8] sm:$0xff] %v167_v5 }
  0x61   :  { %274 = shalt.err (!%p271_p6)
}
  0x62   :  { %s275_s10 = scalar_lea.hbm %s460_s2, 256 }
  0x63   :  { %p276_p7 = scmp.ne.s32.totalorder %s460_s2, %s275_s10  ;;  %p279_p8 = scmp.lt.u32.totalorder %s275_s10, %s460_s2 }
  0x65   :  { %p281_p9 = pnand %p279_p8, %p276_p7 }
  0x67   :  { %284 = shalt.err (!%p281_p9)
}
  0x68   :  { %181 = dma.vmem_to_hbm [thread:$0]  %s176_s6, 256, %s460_s2, [#allocation4], %s293_s0, %s293_s0, %s294_s3  }
  0x69   :  { %289 = dma.done.wait [#allocation4], 256  }
  0x6a   :  { %290 = vsyncadd [#allocation4], 4294967040 }
  0x6b   :  { %185 = vsyncpa [#allocation3], 1 }
  0x6c   :  { %186 = vsyncpa [#allocation6], 1 }
  0x6d   :  { %187 = vsyncpa [#allocation4], 1 }

</bundles_post_ra>
